<compile_context>
chip_gen: v5e
topology: v5e:2x2
jax: 0.10.0
libtpu: 0.0.40
codegen_flags: <defaults>
</compile_context>

<pallas_src>
import math

import jax
import jax.numpy as jnp
from jax import lax
from jax.experimental import pallas as pl
from jax.experimental.pallas import tpu as pltpu


def _round_up(x: int, m: int) -> int:
    return (x + m - 1) // m * m


def _pick_tile(n: int, candidates) -> int:
    """Pick the candidate minimizing padding of n; ties -> larger tile."""
    best_c, best_pad = None, None
    for c in candidates:  # candidates given in descending order
        pad = _round_up(n, c) - n
        if best_pad is None or pad < best_pad:
            best_c, best_pad = c, pad
    return best_c


# --------------------------------------------------------------------------
# Kernels
# --------------------------------------------------------------------------
def _noisy_linear_kres_kernel(x_ref, wmu_ref, wsig_ref, ein_ref, eout_ref,
                              b_ref, o_ref, w_ref):
    """K-resident path.  grid = (out_tiles, batch_tiles) -- batch innermost.

    The noisy weight tile (in_pad, tile_out) is rebuilt from the FACTORIZED
    noise once per out tile (in f32, matching the PyTorch parameter math),
    cached in VMEM scratch in the compute dtype, and reused for every batch
    tile of that out tile.
    """
    @pl.when(pl.program_id(1) == 0)
    def _():
        w = (wmu_ref[...].astype(jnp.float32)
             + wsig_ref[...].astype(jnp.float32)
             * (ein_ref[...].astype(jnp.float32)       # (in_pad, 1)
                * eout_ref[...].astype(jnp.float32)))  # (1, tile_out)
        w_ref[...] = w.astype(w_ref.dtype)

    acc = lax.dot_general(
        x_ref[...], w_ref[...],
        dimension_numbers=(((1,), (0,)), ((), ())),    # canonical (M,K)x(K,N)
        preferred_element_type=jnp.float32,
    )
    o_ref[...] = (acc + b_ref[...]).astype(o_ref.dtype)


def _noisy_linear_ktile_kernel(x_ref, wmu_ref, wsig_ref, ein_ref, eout_ref,
                               b_ref, o_ref, acc_ref):
    """K-tiled fallback (large in_features).  grid = (batch, out, k_tiles)."""
    k = pl.program_id(2)

    @pl.when(k == 0)
    def _():
        acc_ref[...] = jnp.zeros_like(acc_ref)

    w = (wmu_ref[...].astype(jnp.float32)
         + wsig_ref[...].astype(jnp.float32)
         * (ein_ref[...].astype(jnp.float32)
            * eout_ref[...].astype(jnp.float32)))
    acc_ref[...] += lax.dot_general(
        x_ref[...], w.astype(x_ref.dtype),
        dimension_numbers=(((1,), (0,)), ((), ())),
        preferred_element_type=jnp.float32,
    )

    @pl.when(k == pl.num_programs(2) - 1)
    def _():
        o_ref[...] = (acc_ref[...] + b_ref[...]).astype(o_ref.dtype)


# --------------------------------------------------------------------------
# Wrapper
# --------------------------------------------------------------------------
def noisy_linear(x, weight_mu_t, weight_sigma_t, eps_in, eps_out,
                 bias_mu, bias_sigma, *,
                 compute_dtype=jnp.bfloat16,
                 tile_b=None, tile_out=None, tile_k=None,
                 force_k_tiled=False,
                 vmem_budget_bytes=28 * 1024 * 1024):
    """Pallas-backed NoisyLinear forward.

    weight_mu_t / weight_sigma_t are stored transposed: (in_features, out_features).
    y = x @ (weight_mu_t + weight_sigma_t * outer(eps_in, eps_out))
          + (bias_mu + bias_sigma * eps_out)
    which equals the PyTorch F.linear(x, weight_mu + weight_sigma*eps_out⊗eps_in,
    bias_mu + bias_sigma*eps_out).
    """
    batch, in_features = x.shape
    in_w, out_features = weight_mu_t.shape
    assert in_w == in_features
    out_dtype = x.dtype
    cdt = jnp.dtype(compute_dtype).itemsize
    odt = jnp.dtype(out_dtype).itemsize

    # ---- tile selection (minimize dead padding; lane-dense >=128 out tile) --
    if tile_out is None:
        tile_out = _pick_tile(out_features, (512, 256, 128))
    tile_out = min(tile_out, _round_up(out_features, 128))
    if tile_b is None:
        tile_b = _round_up(batch, 8) if batch <= 128 else _pick_tile(batch, (256, 128))
    tile_b = min(tile_b, _round_up(batch, 8))

    out_pad = _round_up(out_features, tile_out)
    b_pad = _round_up(batch, tile_b)
    in_pad = _round_up(in_features, 128)

    # v7x megacore: if the grid would be a single step, split the parallel out
    # axis into >=2 blocks so both TensorCores get work (no-op on v5e/v6e).
    if out_pad // tile_out == 1 and b_pad // tile_b == 1 and out_pad >= 256:
        tile_out = 128

    # ---- K-resident vs K-tiled decision (fit double-buffered set in VMEM) --
    def vmem_a():
        return (2 * (tile_b * in_pad * cdt + 2 * in_pad * tile_out * cdt
                     + in_pad * 4 + 2 * tile_out * 4 + tile_b * tile_out * odt)
                + in_pad * tile_out * cdt)            # + cached weight scratch

    def vmem_b(tk):
        return (2 * (tile_b * tk * cdt + 2 * tk * tile_out * cdt
                     + tk * 4 + 2 * tile_out * 4 + tile_b * tile_out * odt)
                + tile_b * tile_out * 4)              # + f32 accumulator

    use_k_tiled = force_k_tiled or vmem_a() > vmem_budget_bytes
    if use_k_tiled:
        if tile_k is None:
            tile_k = 128
            for cand in (2048, 1024, 512, 256):
                if vmem_b(cand) <= vmem_budget_bytes:
                    tile_k = cand
                    break
        tile_k = min(tile_k, _round_up(in_features, 128))
        in_pad = _round_up(in_features, tile_k)

    needed = vmem_b(tile_k) if use_k_tiled else vmem_a()
    vmem_limit = int(min(max(2 * needed, 16 * 1024 * 1024), 40 * 1024 * 1024))
    vmem_limit = int(max(vmem_limit, needed + 2 * 1024 * 1024))

    # ---- operand prep (bias combine hoisted; weights streamed in bf16) -----
    bias = (bias_mu + bias_sigma * eps_out).reshape(1, out_features).astype(jnp.float32)

    def pad2(a, rows, cols):
        pr, pc = rows - a.shape[0], cols - a.shape[1]
        if pr == 0 and pc == 0:
            return a
        return jnp.pad(a, ((0, pr), (0, pc)))

    xp = pad2(x.astype(compute_dtype), b_pad, in_pad)
    wmu_p = pad2(weight_mu_t.astype(compute_dtype), in_pad, out_pad)
    wsig_p = pad2(weight_sigma_t.astype(compute_dtype), in_pad, out_pad)
    ein_p = pad2(eps_in.reshape(in_features, 1).astype(jnp.float32), in_pad, 1)
    eout_p = pad2(eps_out.reshape(1, out_features).astype(jnp.float32), 1, out_pad)
    bias_p = pad2(bias, 1, out_pad)

    n_out = out_pad // tile_out
    n_bat = b_pad // tile_b
    flops = 2 * b_pad * in_pad * out_pad + 3 * in_pad * out_pad
    small_bytes = 4 * (in_pad + 2 * out_pad)

    if not use_k_tiled:
        cost = pl.CostEstimate(
            flops=flops, transcendentals=0,
            bytes_accessed=(n_out * b_pad * in_pad * cdt       # x per out tile
                            + 2 * in_pad * out_pad * cdt       # weights once
                            + b_pad * out_pad * odt + small_bytes))
        out_padded = pl.pallas_call(
            _noisy_linear_kres_kernel,
            out_shape=jax.ShapeDtypeStruct((b_pad, out_pad), out_dtype),
            grid=(n_out, n_bat),                                # out OUTER, batch INNER
            in_specs=[
                pl.BlockSpec((tile_b, in_pad), lambda j, i: (i, 0)),    # x
                pl.BlockSpec((in_pad, tile_out), lambda j, i: (0, j)),  # weight_mu^T
                pl.BlockSpec((in_pad, tile_out), lambda j, i: (0, j)),  # weight_sigma^T
                pl.BlockSpec((in_pad, 1), lambda j, i: (0, 0)),         # eps_in
                pl.BlockSpec((1, tile_out), lambda j, i: (0, j)),       # eps_out
                pl.BlockSpec((1, tile_out), lambda j, i: (0, j)),       # bias
            ],
            out_specs=pl.BlockSpec((tile_b, tile_out), lambda j, i: (i, j)),
            scratch_shapes=[pltpu.VMEM((in_pad, tile_out), compute_dtype)],
            compiler_params=pltpu.CompilerParams(
                # batch (inner) axis MUST be sequential so the pl.when(i==0)
                # weight-rebuild/scratch-cache is valid under megacore sharding.
                dimension_semantics=("parallel", "arbitrary"),
                vmem_limit_bytes=vmem_limit,
            ),
            cost_estimate=cost,
        )(xp, wmu_p, wsig_p, ein_p, eout_p, bias_p)
    else:
        n_k = in_pad // tile_k
        cost = pl.CostEstimate(
            flops=flops, transcendentals=0,
            bytes_accessed=(n_out * b_pad * in_pad * cdt
                            + n_bat * 2 * in_pad * out_pad * cdt
                            + b_pad * out_pad * odt + small_bytes))
        out_padded = pl.pallas_call(
            _noisy_linear_ktile_kernel,
            out_shape=jax.ShapeDtypeStruct((b_pad, out_pad), out_dtype),
            grid=(n_bat, n_out, n_k),                           # K reduction innermost
            in_specs=[
                pl.BlockSpec((tile_b, tile_k), lambda i, j, k: (i, k)),    # x
                pl.BlockSpec((tile_k, tile_out), lambda i, j, k: (k, j)),  # weight_mu^T
                pl.BlockSpec((tile_k, tile_out), lambda i, j, k: (k, j)),  # weight_sigma^T
                pl.BlockSpec((tile_k, 1), lambda i, j, k: (k, 0)),         # eps_in
                pl.BlockSpec((1, tile_out), lambda i, j, k: (0, j)),       # eps_out
                pl.BlockSpec((1, tile_out), lambda i, j, k: (0, j)),       # bias
            ],
            out_specs=pl.BlockSpec((tile_b, tile_out), lambda i, j, k: (i, j)),
            scratch_shapes=[pltpu.VMEM((tile_b, tile_out), jnp.float32)],
            compiler_params=pltpu.CompilerParams(
                dimension_semantics=("parallel", "parallel", "arbitrary"),
                vmem_limit_bytes=vmem_limit,
            ),
            cost_estimate=cost,
        )(xp, wmu_p, wsig_p, ein_p, eout_p, bias_p)

    return out_padded[:batch, :out_features]


# --------------------------------------------------------------------------
# Parameter / noise init (reset_parameters + reset_noise of the PyTorch module)
# --------------------------------------------------------------------------
def _scale_noise(key, size):
    """Factorized gaussian noise: sign(x) * sqrt(|x|), x ~ N(0, 1)."""
    x = jax.random.normal(key, (size,), dtype=jnp.float32)
    return jnp.sign(x) * jnp.sqrt(jnp.abs(x))


def init_noisy_linear_params(key, in_features, out_features, std_init=0.5):
    """Weights stored TRANSPOSED (in_features, out_features) so the kernel's
    MXU gets the canonical (K,N) RHS with no in-kernel transpose.  The
    factorized noise (eps_in, eps_out) is returned; the dense weight_epsilon
    (= outer(eps_out, eps_in)) is never materialized for the kernel."""
    k_wmu, k_bmu, k_ein, k_eout = jax.random.split(key, 4)
    mu_range = 1.0 / math.sqrt(in_features)

    weight_mu_t = jax.random.uniform(
        k_wmu, (in_features, out_features), jnp.float32, -mu_range, mu_range)
    weight_sigma_t = jnp.full((in_features, out_features),
                              std_init / math.sqrt(in_features), jnp.float32)
    bias_mu = jax.random.uniform(
        k_bmu, (out_features,), jnp.float32, -mu_range, mu_range)
    bias_sigma = jnp.full((out_features,),
                          std_init / math.sqrt(out_features), jnp.float32)
    eps_in = _scale_noise(k_ein, in_features)
    eps_out = _scale_noise(k_eout, out_features)
    return weight_mu_t, weight_sigma_t, eps_in, eps_out, bias_mu, bias_sigma


def noisy_linear_reference(x, wmu_t, wsig_t, eps_in, eps_out, bmu, bsig):
    """Plain-JAX reference == PyTorch F.linear with the dense epsilon."""
    w_t = wmu_t + wsig_t * jnp.outer(eps_in, eps_out)
    return x @ w_t + (bmu + bsig * eps_out)


if __name__ == "__main__":
    key = jax.random.PRNGKey(0)
    k1, k2, k3, kx1, kx2, kx3 = jax.random.split(key, 6)

    # --- Test 1: f32 compute, K-resident path (tight check vs PyTorch math) --
    p1 = init_noisy_linear_params(k1, 32, 64)
    x1 = jax.random.normal(kx1, (8, 32), dtype=jnp.float32)
    y1 = jax.block_until_ready(noisy_linear(x1, *p1, compute_dtype=jnp.float32))
    r1 = noisy_linear_reference(x1, *p1)
    assert y1.shape == (8, 64)
    assert jnp.allclose(y1, r1, atol=1e-4, rtol=1e-5), float(jnp.max(jnp.abs(y1 - r1)))

    # --- Test 2: default bf16 streaming (memory-bound regime), K-resident ----
    p2 = init_noisy_linear_params(k2, 128, 320)
    x2 = jax.random.normal(kx2, (40, 128), dtype=jnp.float32)
    y2 = jax.block_until_ready(noisy_linear(x2, *p2))  # compute_dtype=bf16
    r2 = noisy_linear_reference(x2, *p2)
    wmu_t, wsig_t, ein, eout, bmu, bsig = p2
    f32 = jnp.float32
    w_bf = (wmu_t.astype(jnp.bfloat16).astype(f32)
            + wsig_t.astype(jnp.bfloat16).astype(f32) * jnp.outer(ein, eout)
            ).astype(jnp.bfloat16).astype(f32)
    x_bf = x2.astype(jnp.bfloat16).astype(f32)
    r2_bf = x_bf @ w_bf + (bmu + bsig * eout)          # what the kernel computes
    assert jnp.allclose(y2, r2_bf, atol=2e-3, rtol=2e-3), float(jnp.max(jnp.abs(y2 - r2_bf)))
    assert jnp.allclose(y2, r2, atol=1e-1, rtol=1e-1), float(jnp.max(jnp.abs(y2 - r2)))

    # --- Test 3: forced K-tiled fallback (accumulator path), f32, tight ------
    p3 = init_noisy_linear_params(k3, 384, 256)
    x3 = jax.random.normal(kx3, (24, 384), dtype=jnp.float32)
    y3 = jax.block_until_ready(
        noisy_linear(x3, *p3, compute_dtype=jnp.float32,
                     force_k_tiled=True, tile_k=128))
    r3 = noisy_linear_reference(x3, *p3)
    assert jnp.allclose(y3, r3, atol=2e-4, rtol=1e-4), float(jnp.max(jnp.abs(y3 - r3)))

    print("KERNEL_OK")
</pallas_src>

<mosaic_0001>
module attributes {stable_mosaic.version = 11 : i64} {
  func.func @_noisy_linear_kres_kernel(%arg0: i32, %arg1: i32, %arg2: memref<8x128xf32, #tpu.memory_space<vmem>>, %arg3: memref<128x128xf32, #tpu.memory_space<vmem>>, %arg4: memref<128x128xf32, #tpu.memory_space<vmem>>, %arg5: memref<128x1xf32, #tpu.memory_space<vmem>>, %arg6: memref<1x128xf32, #tpu.memory_space<vmem>>, %arg7: memref<1x128xf32, #tpu.memory_space<vmem>>, %arg8: memref<8x128xf32, #tpu.memory_space<vmem>>, %arg9: memref<128x128xf32, #tpu.memory_space<vmem>>) attributes {dimension_semantics = [#tpu.dimension_semantics<parallel>, #tpu.dimension_semantics<arbitrary>], iteration_bounds = array<i64: 1, 1>, scalar_prefetch = 0 : i64, scratch_operands = 1 : i64, tpu.core_type = #tpu.core_type<tc>, window_params = [{transform_indices = @transform_0, window_bounds = array<i64: 8, 128>}, {transform_indices = @transform_1, window_bounds = array<i64: 128, 128>}, {transform_indices = @transform_2, window_bounds = array<i64: 128, 128>}, {pipeline_mode = #tpu.pipeline_mode<synchronous>, transform_indices = @transform_3, window_bounds = array<i64: 128, 1>}, {transform_indices = @transform_4, window_bounds = array<i64: 1, 128>}, {transform_indices = @transform_5, window_bounds = array<i64: 1, 128>}, {transform_indices = @transform_6, window_bounds = array<i64: 8, 128>}]} {
    %c0_i32 = arith.constant 0 : i32
    %0 = arith.cmpi eq, %arg1, %c0_i32 : i32
    %1 = arith.extui %0 : i1 to i32
    %c0_i32_0 = arith.constant 0 : i32
    %2 = arith.cmpi ne, %1, %c0_i32_0 : i32
    scf.if %2 {
      %c0_8 = arith.constant 0 : index
      %c0_9 = arith.constant 0 : index
      %10 = vector.load %arg3[%c0_8, %c0_9] : memref<128x128xf32, #tpu.memory_space<vmem>>, vector<128x128xf32>
      %c0_10 = arith.constant 0 : index
      %c0_11 = arith.constant 0 : index
      %11 = vector.load %arg4[%c0_10, %c0_11] : memref<128x128xf32, #tpu.memory_space<vmem>>, vector<128x128xf32>
      %c0_12 = arith.constant 0 : index
      %c0_13 = arith.constant 0 : index
      %12 = vector.load %arg5[%c0_12, %c0_13] : memref<128x1xf32, #tpu.memory_space<vmem>>, vector<128x1xf32>
      %c0_14 = arith.constant 0 : index
      %c0_15 = arith.constant 0 : index
      %13 = vector.load %arg6[%c0_14, %c0_15] : memref<1x128xf32, #tpu.memory_space<vmem>>, vector<1x128xf32>
      %14 = vector.broadcast %12 : vector<128x1xf32> to vector<128x128xf32>
      %15 = vector.broadcast %13 : vector<1x128xf32> to vector<128x128xf32>
      %16 = arith.mulf %14, %15 : vector<128x128xf32>
      %17 = arith.mulf %11, %16 : vector<128x128xf32>
      %18 = arith.addf %10, %17 : vector<128x128xf32>
      %c0_16 = arith.constant 0 : index
      %c0_17 = arith.constant 0 : index
      %19 = vector.load %arg9[%c0_16, %c0_17] : memref<128x128xf32, #tpu.memory_space<vmem>>, vector<128x128xf32>
      tpu.vector_store %arg9[%c0_16, %c0_17], %18 {strides = array<i32>} : memref<128x128xf32, #tpu.memory_space<vmem>>, vector<128x128xf32>,
    } else {
    }
    %c0 = arith.constant 0 : index
    %c0_1 = arith.constant 0 : index
    %3 = vector.load %arg2[%c0, %c0_1] : memref<8x128xf32, #tpu.memory_space<vmem>>, vector<8x128xf32>
    %c0_2 = arith.constant 0 : index
    %c0_3 = arith.constant 0 : index
    %4 = vector.load %arg9[%c0_2, %c0_3] : memref<128x128xf32, #tpu.memory_space<vmem>>, vector<128x128xf32>
    %cst = arith.constant dense<0.000000e+00> : vector<8x128xf32>
    %5 = tpu.matmul %3, %4, %cst {dimension_numbers = #tpu.dot_dimension_numbers<[1], [0], [0], [1], [0, 0, 1, 1], [], []>} : vector<8x128xf32>, vector<128x128xf32>, vector<8x128xf32> -> vector<8x128xf32>
    %c0_4 = arith.constant 0 : index
    %c0_5 = arith.constant 0 : index
    %6 = vector.load %arg7[%c0_4, %c0_5] : memref<1x128xf32, #tpu.memory_space<vmem>>, vector<1x128xf32>
    %7 = vector.broadcast %6 : vector<1x128xf32> to vector<8x128xf32>
    %8 = arith.addf %5, %7 : vector<8x128xf32>
    %c0_6 = arith.constant 0 : index
    %c0_7 = arith.constant 0 : index
    %9 = vector.load %arg8[%c0_6, %c0_7] : memref<8x128xf32, #tpu.memory_space<vmem>>, vector<8x128xf32>
    tpu.vector_store %arg8[%c0_6, %c0_7], %8 {strides = array<i32>} : memref<8x128xf32, #tpu.memory_space<vmem>>, vector<8x128xf32>,
    return
  }
  func.func @transform_0(%arg0: i32, %arg1: i32) -> (i32, i32) {
    %c0_i32 = arith.constant 0 : i32
    %c0_i32_0 = arith.constant 0 : i32
    return %arg1, %c0_i32 : i32, i32
  }
  func.func @transform_1(%arg0: i32, %arg1: i32) -> (i32, i32) {
    %c0_i32 = arith.constant 0 : i32
    %c0_i32_0 = arith.constant 0 : i32
    return %c0_i32, %arg0 : i32, i32
  }
  func.func @transform_2(%arg0: i32, %arg1: i32) -> (i32, i32) {
    %c0_i32 = arith.constant 0 : i32
    %c0_i32_0 = arith.constant 0 : i32
    return %c0_i32, %arg0 : i32, i32
  }
  func.func @transform_3(%arg0: i32, %arg1: i32) -> (i32, i32) {
    %c0_i32 = arith.constant 0 : i32
    %c0_i32_0 = arith.constant 0 : i32
    %c0_i32_1 = arith.constant 0 : i32
    return %c0_i32, %c0_i32_0 : i32, i32
  }
  func.func @transform_4(%arg0: i32, %arg1: i32) -> (i32, i32) {
    %c0_i32 = arith.constant 0 : i32
    %c0_i32_0 = arith.constant 0 : i32
    return %c0_i32, %arg0 : i32, i32
  }
  func.func @transform_5(%arg0: i32, %arg1: i32) -> (i32, i32) {
    %c0_i32 = arith.constant 0 : i32
    %c0_i32_0 = arith.constant 0 : i32
    return %c0_i32, %arg0 : i32, i32
  }
  func.func @transform_6(%arg0: i32, %arg1: i32) -> (i32, i32) {
    %c0_i32 = arith.constant 0 : i32
    return %arg1, %arg0 : i32, i32
  }
}

</mosaic_0001>

<bundles_post_ra>
// kernel: tpu_custom_call.1
= control target key start
LH: loop header
LB: loop body
LE: loop exit
PB: predicated region body
PF: predicated region fallthrough
CT: control target
= control target key end

     0   :  { %11 = vsyncpa [#allocation4], 0  ;;  %s573_s0 = inlined_call_operand.hbm [shape: f32[8,128], index: 0, kind: input, shape index: {}]   ;;  %s574_s1 = inlined_call_operand.vmem [shape: f32[128,128], index: 1, kind: input, shape index: {}]   ;;  %s575_s2 = inlined_call_operand.hbm [shape: f32[128,128], index: 2, kind: input, shape index: {}]   ;;  %s576_s3 = inlined_call_operand.vmem [shape: f32[128,1], index: 3, kind: input, shape index: {}]   ;;  %s577_s4 = inlined_call_operand.vmem [shape: f32[1,128], index: 4, kind: input, shape index: {}]   ;;  %s578_s5 = inlined_call_operand.vmem [shape: f32[1,128], index: 5, kind: input, shape index: {}]   ;;  %s579_s6 = inlined_call_operand.hbm [shape: f32[8,128], index: 6, kind: output, shape index: {}]  }
   0x1   :  { %12 = vsyncpa [#allocation7], 0 }
   0x2   :  { %13 = vsyncpa [#allocation5], 0  ;;  %s19_s23 = sshll.u32 %s573_s0, 4  ;;  %s403_s24 = smov [#allocation3]   ;;  %s20_s23 = int_to_ptr.hbm [resolvable:$true] %s19_s23 }
   0x3   :  { %s21_s25 = sshll.u32 %s403_s24, 4  ;;  %s31_s28 = sshll.u32 %s575_s2, 4  ;;  %s22_s25 = int_to_ptr.vmem [resolvable:$true] %s21_s25  ;;  %s32_s28 = int_to_ptr.hbm [resolvable:$true] %s31_s28 }
   0x4   :  { %24 = dma.hbm_to_vmem [thread:$0]  %s20_s23, 128, %s22_s25, [#allocation4]  }
   0x5   :  { %s404_s29 = smov [#allocation6]   ;;  %s405_s7 = smov 128  }
   0x6   :  { %s33_s30 = sshll.u32 %s404_s29, 4  ;;  %s406_s8 = smov 8   ;;  %s34_s30 = int_to_ptr.vmem [resolvable:$true] %s33_s30 }
   0x7   :  { %39 = dma.hbm_to_vmem [thread:$0]  %s32_s28, 2048, %s34_s30, [#allocation7], %s405_s7, %s405_s7, %s406_s8  }
   0x8   :  { %397 = dma.done.wait [#allocation4], 128  }
   0x9   :  { %398 = vsyncadd [#allocation4], 4294967168 }
   0xa   :  { %399 = dma.done.wait [#allocation7], 2048  }
   0xb   :  { %400 = vsyncadd [#allocation7], 4294965248  ;;  %v407_v0 = vmov 0   ;;  %v105_v1 = vld [vmem:[%s576_s3 + $0x78] sm:$0xff]  ;;  %v103_v2 = vld [vmem:[%s576_s3 + $0x68] sm:$0xff]  ;;  %s408_s19 = smov [#allocation8]  }
   0xc   :  { %322 = vset.pattern.permute.xlu2 %v407_v0  ;;  %321 = vset.pattern.permute.xlu1 %v407_v0  ;;  %v101_v3 = vld [vmem:[%s576_s3 + $0x58] sm:$0xff]  ;;  %v104_v4 = vld [vmem:[%s576_s3 + $0x70] sm:$0xff]  ;;  %v102_v5 = vld [vmem:[%s576_s3 + $0x60] sm:$0xff]  ;;  %s301_s20 = sshll.u32 %s408_s19, 4  ;;  %s303_s23 = sshll.u32 %s579_s6, 4  ;;  %s302_s20 = int_to_ptr.vmem [resolvable:$true] %s301_s20  ;;  %s304_s23 = int_to_ptr.hbm [resolvable:$true] %s303_s23 }
   0xd   :  { %320 = vset.pattern.permute.xlu0 %v407_v0  ;;  %174 = vperm.xlu1 %321, %v103_v2   ;;  %v100_v6 = vld [vmem:[%s576_s3 + $0x50] sm:$0xff]  ;;  %v99_v7 = vld [vmem:[%s576_s3 + $0x48] sm:$0xff]  ;;  %v98_v8 = vld [vmem:[%s576_s3 + $0x40] sm:$0xff] }
   0xe   :  { %184 = vperm.xlu0 %320, %v105_v1   ;;  %164 = vperm.xlu2 %322, %v101_v3   ;;  %v97_v9 = vld [vmem:[%s576_s3 + $0x38] sm:$0xff]  ;;  %v96_v10 = vld [vmem:[%s576_s3 + $0x30] sm:$0xff]  ;;  %v95_v11 = vld [vmem:[%s576_s3 + $0x28] sm:$0xff] }
   0xf   :  { %v94_v12 = vld [vmem:[%s576_s3 + $0x20] sm:$0xff]  ;;  %v93_v13 = vld [vmem:[%s576_s3 + $0x18] sm:$0xff]  ;;  %v92_v14 = vld [vmem:[%s576_s3 + $0x10] sm:$0xff] }
  0x10   :  { %v91_v15 = vld [vmem:[%s576_s3 + $0x8] sm:$0xff]  ;;  %v90_v16 = vld [vmem:[%s576_s3] sm:$0xff]  ;;  %v73_v24 = vld [vmem:[%s574_s1 + $0x78] sm:$0xff] }
  0x11   :  { %v501_v18 = vld [vmem:[%s577_s4] ss:$0 sm:$0xff]  ;;  %v87_v28 = vld [vmem:[#allocation6 + $0x68] sm:$0xff]  ;;  %v88_v30 = vld [vmem:[#allocation6 + $0x70] sm:$0xff] }
  0x12   :  { %v89_v22 = vld [vmem:[#allocation6 + $0x78] sm:$0xff]  ;;  %v86_v35 = vld [vmem:[#allocation6 + $0x60] sm:$0xff]  ;;  %v72_v36 = vld [vmem:[%s574_s1 + $0x70] sm:$0xff] }
  0x13   :  { %v85_v40 = vld [vmem:[#allocation6 + $0x58] sm:$0xff]  ;;  %v71_v41 = vld [vmem:[%s574_s1 + $0x68] sm:$0xff]  ;;  %v84_v45 = vld [vmem:[#allocation6 + $0x50] sm:$0xff] }
  0x14   :  { %v70_v46 = vld [vmem:[%s574_s1 + $0x60] sm:$0xff]  ;;  %v83_v50 = vld [vmem:[#allocation6 + $0x48] sm:$0xff]  ;;  %v69_v52 = vld [vmem:[%s574_s1 + $0x58] sm:$0xff] }
  0x15   :  { %169 = vperm.xlu1 %321, %v102_v5   ;;  %v82_v57 = vld [vmem:[#allocation6 + $0x40] sm:$0xff]  ;;  %v68_v58 = vld [vmem:[%s574_s1 + $0x50] sm:$0xff]  ;;  %v81_v62 = vld [vmem:[#allocation6 + $0x38] sm:$0xff] }
  0x16   :  { %179 = vperm.xlu0 %320, %v104_v4   ;;  %159 = vperm.xlu2 %322, %v100_v6   ;;  %v67_v0 = vld [vmem:[%s574_s1 + $0x48] sm:$0xff]  ;;  %v66_v3 = vld [vmem:[%s574_s1 + $0x40] sm:$0xff] }
  0x1d   :  { %149 = vperm.xlu1 %321, %v98_v8  }
  0x1e   :  { %154 = vperm.xlu0 %320, %v99_v7   ;;  %144 = vperm.xlu2 %322, %v97_v9   ;;  %v80_v7 = vld [vmem:[#allocation6 + $0x30] sm:$0xff]  ;;  %v79_v9 = vld [vmem:[#allocation6 + $0x28] sm:$0xff] }
  0x25   :  { %134 = vperm.xlu1 %321, %v95_v11  }
  0x26   :  { %139 = vperm.xlu0 %320, %v96_v10   ;;  %129 = vperm.xlu2 %322, %v94_v12   ;;  %v65_v10 = vld [vmem:[%s574_s1 + $0x38] sm:$0xff] }
  0x2d   :  { %119 = vperm.xlu1 %321, %v92_v14  }
  0x2e   :  { %124 = vperm.xlu0 %320, %v93_v13   ;;  %114 = vperm.xlu2 %322, %v91_v15   ;;  %v78_v15 = vld [vmem:[#allocation6 + $0x20] sm:$0xff] }
  0x36   :  { %109 = vperm.xlu0 %320, %v90_v16   ;;  %v64_v16 = vld [vmem:[%s574_s1 + $0x30] sm:$0xff] }
  0x68   :  { %v165_v17 = vpop.permute.xlu2 %164 }
  0x69   :  { %v201_v37 = vmul.f32 %v501_v18, %v165_v17 }
  0x6b   :  { %v217_v47 = vmul.f32 %v201_v37, %v85_v40 }
  0x6d   :  { %v233_v61 = vadd.f32 %v217_v47, %v69_v52  ;;  %v324_v52 = vld [vmem:[%s578_s5] ss:$0 sm:$0xff] }
  0x70   :  { %v160_v19 = vpop.permute.xlu2 %159 }
  0x71   :  { %v200_v42 = vmul.f32 %v501_v18, %v160_v19 }
  0x73   :  { %v216_v53 = vmul.f32 %v200_v42, %v84_v45  ;;  %v59_v42 = vld [vmem:[%s574_s1 + $0x8] sm:$0xff] }
  0x74   :  { %v74_v45 = vld [vmem:[#allocation6] sm:$0xff] }
  0x75   :  { %v232_v2 = vadd.f32 %v216_v53, %v68_v58 }
  0x78   :  { %v145_v34 = vpop.permute.xlu2 %144 }
  0x79   :  { %v197_v59 = vmul.f32 %v501_v18, %v145_v34 }
  0x7b   :  { %v213_v4 = vmul.f32 %v197_v59, %v81_v62 }
  0x7f   :  { %v175_v21 = vpop.permute.xlu1 %174 }
  0x80   :  { %v185_v20 = vpop.permute.xlu0 %184  ;;  %v203_v27 = vmul.f32 %v501_v18, %v175_v21  ;;  %v130_v63 = vpop.permute.xlu2 %129  ;;  %v63_v21 = vld [vmem:[%s574_s1 + $0x28] sm:$0xff] }
  0x81   :  { %v205_v23 = vmul.f32 %v501_v18, %v185_v20  ;;  %v194_v11 = vmul.f32 %v501_v18, %v130_v63  ;;  %v229_v20 = vadd.f32 %v213_v4, %v65_v10 }
  0x82   :  { %v219_v38 = vmul.f32 %v203_v27, %v87_v28  ;;  %v77_v28 = vld [vmem:[#allocation6 + $0x18] sm:$0xff] }
  0x83   :  { %v221_v25 = vmul.f32 %v205_v23, %v89_v22  ;;  %v210_v22 = vmul.f32 %v194_v11, %v78_v15 }
  0x84   :  { %v235_v48 = vadd.f32 %v219_v38, %v71_v41 }
  0x85   :  { %v237_v26 = vadd.f32 %v221_v25, %v73_v24  ;;  %v62_v25 = vld [vmem:[%s574_s1 + $0x20] sm:$0xff] }
  0x86   :  { %v226_v34 = vadd.f32 %v210_v22, %v62_v25 }
  0x87   :  { %275 = vmatpush.msra.mxu0 %v237_v26  ;;  %v170_v31 = vpop.permute.xlu1 %169 }
  0x88   :  { %v180_v29 = vpop.permute.xlu0 %179  ;;  %v202_v33 = vmul.f32 %v501_v18, %v170_v31  ;;  %v115_v24 = vpop.permute.xlu2 %114 }
  0x89   :  { %v204_v32 = vmul.f32 %v501_v18, %v180_v29  ;;  %v191_v31 = vmul.f32 %v501_v18, %v115_v24 }
  0x8a   :  { %v218_v43 = vmul.f32 %v202_v33, %v86_v35  ;;  %v75_v35 = vld [vmem:[#allocation6 + $0x8] sm:$0xff] }
  0x8b   :  { %v220_v39 = vmul.f32 %v204_v32, %v88_v30  ;;  %v76_v30 = vld [vmem:[#allocation6 + $0x10] sm:$0xff]  ;;  %v207_v40 = vmul.f32 %v191_v31, %v75_v35 }
  0x8c   :  { %v234_v56 = vadd.f32 %v218_v43, %v70_v46 }
  0x8d   :  { %v236_v44 = vadd.f32 %v220_v39, %v72_v36  ;;  %v61_v36 = vld [vmem:[%s574_s1 + $0x18] sm:$0xff]  ;;  %v60_v39 = vld [vmem:[%s574_s1 + $0x10] sm:$0xff]  ;;  %v223_v47 = vadd.f32 %v207_v40, %v59_v42 }
  0x8f   :  { %276 = vmatpush.msra.mxu0 %v236_v44  ;;  %v150_v51 = vpop.permute.xlu1 %149 }
  0x90   :  { %v155_v49 = vpop.permute.xlu0 %154  ;;  %v198_v55 = vmul.f32 %v501_v18, %v150_v51  ;;  %v254_v51 = vld [vmem:[#allocation3] sm:$0xff] }
  0x91   :  { %v199_v54 = vmul.f32 %v501_v18, %v155_v49  ;;  %277 = vmatpush.msra.mxu0 %v235_v48  ;;  %v58_v48 = vld [vmem:[%s574_s1] sm:$0xff] }
  0x92   :  { %v214_v1 = vmul.f32 %v198_v55, %v82_v57 }
  0x93   :  { %v215_v60 = vmul.f32 %v199_v54, %v83_v50  ;;  %278 = vmatpush.msra.mxu0 %v234_v56 }
  0x94   :  { %v230_v14 = vadd.f32 %v214_v1, %v66_v3 }
  0x95   :  { %279 = vmatpush.msra.mxu0 %v233_v61  ;;  %v231_v5 = vadd.f32 %v215_v60, %v67_v0 }
  0x97   :  { %280 = vmatpush.msra.mxu0 %v232_v2  ;;  %v135_v8 = vpop.permute.xlu1 %134 }
  0x98   :  { %v140_v6 = vpop.permute.xlu0 %139  ;;  %v195_v13 = vmul.f32 %v501_v18, %v135_v8 }
  0x99   :  { %v196_v12 = vmul.f32 %v501_v18, %v140_v6  ;;  %281 = vmatpush.msra.mxu0 %v231_v5 }
  0x9a   :  { %v211_v19 = vmul.f32 %v195_v13, %v79_v9 }
  0x9b   :  { %v212_v17 = vmul.f32 %v196_v12, %v80_v7  ;;  %282 = vmatpush.msra.mxu0 %v230_v14 }
  0x9c   :  { %v227_v26 = vadd.f32 %v211_v19, %v63_v21 }
  0x9d   :  { %283 = vmatpush.msra.mxu0 %v229_v20  ;;  %v228_v23 = vadd.f32 %v212_v17, %v64_v16 }
  0x9f   :  { %284 = vmatpush.msra.mxu0 %v228_v23  ;;  %v120_v29 = vpop.permute.xlu1 %119 }
  0xa0   :  { %v125_v27 = vpop.permute.xlu0 %124  ;;  %v192_v33 = vmul.f32 %v501_v18, %v120_v29 }
  0xa1   :  { %v193_v32 = vmul.f32 %v501_v18, %v125_v27  ;;  %285 = vmatpush.msra.mxu0 %v227_v26 }
  0xa2   :  { %v208_v38 = vmul.f32 %v192_v33, %v76_v30 }
  0xa3   :  { %v209_v37 = vmul.f32 %v193_v32, %v77_v28  ;;  %286 = vmatpush.msra.mxu0 %v226_v34 }
  0xa4   :  { %v224_v43 = vadd.f32 %v208_v38, %v60_v39 }
  0xa5   :  { %v225_v41 = vadd.f32 %v209_v37, %v61_v36 }
  0xa7   :  { %287 = vmatpush.msra.mxu0 %v225_v41 }
  0xa8   :  { %v110_v44 = vpop.permute.xlu0 %109 }
  0xa9   :  { %v190_v46 = vmul.f32 %v501_v18, %v110_v44  ;;  %288 = vmatpush.msra.mxu0 %v224_v43 }
  0xab   :  { %v206_v49 = vmul.f32 %v190_v46, %v74_v45  ;;  %289 = vmatpush.msra.mxu0 %v223_v47 }
  0xad   :  { %v222_v50 = vadd.f32 %v206_v49, %v58_v48 }
  0xaf   :  { %290 = vmatpush.msra.mxu0 %v222_v50 }
  0xb0   :  { %291 = vmatmul.f32.vlgmr.msra.gmra.mxu0 %v254_v51 }
 0x12d   :  { %v292_v18 = vpop.f32.mrf.mxu0 }
 0x12e   :  { %v293_v53 = vadd.f32 %v324_v52, %v292_v18 }
 0x130   :  { %295 = vst [vmem:[#allocation8] sm:$0xff] %v293_v53 }
 0x131   :  { %306 = dma.vmem_to_hbm [thread:$0]  %s302_s20, 128, %s304_s23, [#allocation5]  }
 0x132   :  { %401 = dma.done.wait [#allocation5], 128  }
 0x133   :  { %402 = vsyncadd [#allocation5], 4294967168 }
 0x134   :  { %311 = vsyncpa [#allocation4], 1 }
 0x135   :  { %312 = vsyncpa [#allocation7], 1 }
 0x136   :  { %313 = vsyncpa [#allocation5], 1 }

</bundles_post_ra>
